<compile_context>
chip_gen: v5e
topology: v5e:2x2
jax: 0.10.0
libtpu: 0.0.40
codegen_flags: <defaults>
</compile_context>

<pallas_src>
import jax
import jax.numpy as jnp
from jax import lax
from jax.experimental import pallas as pl
from jax.experimental.pallas import tpu as pltpu


def _graph_conv_bn_kernel(agg_ref, x_ref, wrel_ref, wroot_ref, ss_ref, o_ref):
    """One (tm, tn) output tile, full-K contraction in a single step.

    agg_ref, x_ref       : (tm, K)   aggregated neighbours / node features
    wrel_ref, wroot_ref  : (K, tn)   weights pre-transposed to (in, out)
    ss_ref               : (2, tn)   row 0 = scale, row 1 = shift (folded BN)
    o_ref                : (tm, tn)
    """
    dn = (((1,), (0,)), ((), ()))
    acc = lax.dot_general(agg_ref[...], wrel_ref[...], dn,
                          preferred_element_type=jnp.float32)
    acc = acc + lax.dot_general(x_ref[...], wroot_ref[...], dn,
                                preferred_element_type=jnp.float32)
    # conv-bias + BatchNorm + ReLU epilogue, single output store.
    y = acc * ss_ref[0:1, :] + ss_ref[1:2, :]
    o_ref[...] = jnp.maximum(y, 0.0).astype(o_ref.dtype)


def _round_up(a, b):
    return ((a + b - 1) // b) * b


@jax.jit
def graph_conv_bn(x, edge_index, w_rel, b_rel, w_root,
                  gamma, beta, running_mean, running_var, eps=1e-5):
    """GraphConvBn forward.

    x            : (num_nodes, in_channels) float32
    edge_index   : (2, num_edges) int32, row 0 = source, row 1 = target
    w_rel, w_root: (out_channels, in_channels)  (PyTorch Linear layout)
    b_rel, gamma, beta, running_mean, running_var: (out_channels,)
    returns      : (num_nodes, out_channels) = relu(bn(graph_conv(x)))
    """
    M, K = x.shape
    N = w_rel.shape[0]

    # --- neighbour aggregation: agg[i] = sum_{e: dst[e]==i} x[src[e]] ---
    # TODO(synk): the data-dependent edge gather / scatter-add has no clean
    # tiled Pallas equivalent; a fused version would sort edges by destination
    # and stream source rows via manual make_async_copy (paged-attn pattern).
    src, dst = edge_index[0], edge_index[1]
    agg = jnp.zeros((M, K), x.dtype).at[dst].add(x[src])

    # --- fold inference-mode BatchNorm (+ conv bias) into per-channel affine ---
    inv_std = lax.rsqrt(running_var + eps)
    scale = gamma * inv_std                           # (N,)
    shift = beta + (b_rel - running_mean) * scale     # (N,)
    ss = jnp.stack([scale, shift])                    # (2, N)

    # --- tiling (static shapes under jit) ---
    Np = _round_up(N, 128)                            # lane-dense output stores
    if Np <= 512:
        tn = Np
    elif Np % 256 == 0:
        tn = 256                                      # 2x256^2 MXU on v6e/v7x
    else:
        tn = 128
    tm = min(1024, _round_up(M, 8))                   # big M tiles; fits VMEM
    Mp = _round_up(M, tm)

    # --- padding: K untouched; M only if it does not fit tm; N to 128 ---
    if Mp != M:
        pad_m = ((0, Mp - M), (0, 0))
        agg_p = jnp.pad(agg, pad_m)
        x_p = jnp.pad(x, pad_m)
    else:
        agg_p, x_p = agg, x
    wrel_t = jnp.pad(w_rel.T, ((0, 0), (0, Np - N)))   # (K, Np), one-time
    wroot_t = jnp.pad(w_root.T, ((0, 0), (0, Np - N)))
    ss_p = jnp.pad(ss, ((0, 0), (0, Np - N)))

    out = pl.pallas_call(
        _graph_conv_bn_kernel,
        out_shape=jax.ShapeDtypeStruct((Mp, Np), x.dtype),
        grid_spec=pltpu.PrefetchScalarGridSpec(
            num_scalar_prefetch=0,
            grid=(Mp // tm, Np // tn),
            in_specs=[
                pl.BlockSpec((tm, K), lambda i, j: (i, 0)),    # agg  (full K)
                pl.BlockSpec((tm, K), lambda i, j: (i, 0)),    # x    (full K)
                pl.BlockSpec((K, tn), lambda i, j: (0, j)),    # w_rel^T
                pl.BlockSpec((K, tn), lambda i, j: (0, j)),    # w_root^T
                pl.BlockSpec((2, tn), lambda i, j: (0, j)),    # scale/shift
            ],
            out_specs=pl.BlockSpec((tm, tn), lambda i, j: (i, j)),
        ),
        compiler_params=pltpu.CompilerParams(
            dimension_semantics=("parallel", "parallel"),
        ),
    )(agg_p, x_p, wrel_t, wroot_t, ss_p)

    return out[:M, :N]


if __name__ == "__main__":
    num_nodes, num_edges = 200, 600
    in_channels, out_channels = 160, 96
    eps = 1e-5

    key = jax.random.PRNGKey(0)
    kx, ks, kd, kwr, kwl, kb, kg, kbe, km, kv = jax.random.split(key, 10)

    x = jax.random.normal(kx, (num_nodes, in_channels), jnp.float32)
    src = jax.random.randint(ks, (num_edges,), 0, num_nodes, jnp.int32)
    dst = jax.random.randint(kd, (num_edges,), 0, num_nodes, jnp.int32)
    edge_index = jnp.stack([src, dst])

    bound = 1.0 / (in_channels ** 0.5)
    w_rel = jax.random.uniform(kwr, (out_channels, in_channels),
                               jnp.float32, -bound, bound)
    w_root = jax.random.uniform(kwl, (out_channels, in_channels),
                                jnp.float32, -bound, bound)
    b_rel = jax.random.uniform(kb, (out_channels,), jnp.float32, -bound, bound)

    gamma = jax.random.uniform(kg, (out_channels,), jnp.float32, 0.5, 1.5)
    beta = jax.random.uniform(kbe, (out_channels,), jnp.float32, -0.5, 0.5)
    running_mean = 0.1 * jax.random.normal(km, (out_channels,), jnp.float32)
    running_var = jax.random.uniform(kv, (out_channels,), jnp.float32, 0.5, 1.5)

    out = graph_conv_bn(x, edge_index, w_rel, b_rel, w_root,
                        gamma, beta, running_mean, running_var, eps)
    out = jax.block_until_ready(out)

    # --- pure-JAX reference (eval-mode / running-stats BatchNorm) ---
    agg = jnp.zeros((num_nodes, in_channels), jnp.float32).at[dst].add(x[src])
    conv = (jnp.dot(agg, w_rel.T, precision=lax.Precision.HIGHEST) + b_rel
            + jnp.dot(x, w_root.T, precision=lax.Precision.HIGHEST))
    bn = (conv - running_mean) / jnp.sqrt(running_var + eps) * gamma + beta
    ref = jnp.maximum(bn, 0.0)

    assert out.shape == (num_nodes, out_channels)
    max_err = float(jnp.max(jnp.abs(out - ref)))
    assert jnp.allclose(out, ref, atol=1e-3, rtol=1e-3), f"max_err={max_err}"

    print("KERNEL_OK")
</pallas_src>

<mosaic_0001>
module attributes {stable_mosaic.version = 11 : i64} {
  func.func @_graph_conv_bn_kernel(%arg0: i32, %arg1: i32, %arg2: memref<200x160xf32, #tpu.memory_space<vmem>>, %arg3: memref<200x160xf32, #tpu.memory_space<vmem>>, %arg4: memref<160x128xf32, #tpu.memory_space<vmem>>, %arg5: memref<160x128xf32, #tpu.memory_space<vmem>>, %arg6: memref<2x128xf32, #tpu.memory_space<vmem>>, %arg7: memref<200x128xf32, #tpu.memory_space<vmem>>) attributes {dimension_semantics = [#tpu.dimension_semantics<parallel>, #tpu.dimension_semantics<parallel>], iteration_bounds = array<i64: 1, 1>, scalar_prefetch = 0 : i64, scratch_operands = 0 : i64, tpu.core_type = #tpu.core_type<tc>, window_params = [{transform_indices = @transform_0, window_bounds = array<i64: 200, 160>}, {transform_indices = @transform_1, window_bounds = array<i64: 200, 160>}, {transform_indices = @transform_2, window_bounds = array<i64: 160, 128>}, {transform_indices = @transform_3, window_bounds = array<i64: 160, 128>}, {transform_indices = @transform_4, window_bounds = array<i64: 2, 128>}, {transform_indices = @transform_5, window_bounds = array<i64: 200, 128>}]} {
    %c0 = arith.constant 0 : index
    %c0_0 = arith.constant 0 : index
    %0 = vector.load %arg2[%c0, %c0_0] : memref<200x160xf32, #tpu.memory_space<vmem>>, vector<200x160xf32>
    %c0_1 = arith.constant 0 : index
    %c0_2 = arith.constant 0 : index
    %1 = vector.load %arg4[%c0_1, %c0_2] : memref<160x128xf32, #tpu.memory_space<vmem>>, vector<160x128xf32>
    %cst = arith.constant dense<0.000000e+00> : vector<200x128xf32>
    %2 = tpu.matmul %0, %1, %cst {dimension_numbers = #tpu.dot_dimension_numbers<[1], [0], [0], [1], [0, 0, 1, 1], [], []>} : vector<200x160xf32>, vector<160x128xf32>, vector<200x128xf32> -> vector<200x128xf32>
    %c0_3 = arith.constant 0 : index
    %c0_4 = arith.constant 0 : index
    %3 = vector.load %arg3[%c0_3, %c0_4] : memref<200x160xf32, #tpu.memory_space<vmem>>, vector<200x160xf32>
    %c0_5 = arith.constant 0 : index
    %c0_6 = arith.constant 0 : index
    %4 = vector.load %arg5[%c0_5, %c0_6] : memref<160x128xf32, #tpu.memory_space<vmem>>, vector<160x128xf32>
    %cst_7 = arith.constant dense<0.000000e+00> : vector<200x128xf32>
    %5 = tpu.matmul %3, %4, %cst_7 {dimension_numbers = #tpu.dot_dimension_numbers<[1], [0], [0], [1], [0, 0, 1, 1], [], []>} : vector<200x160xf32>, vector<160x128xf32>, vector<200x128xf32> -> vector<200x128xf32>
    %6 = arith.addf %2, %5 : vector<200x128xf32>
    %c0_8 = arith.constant 0 : index
    %c0_9 = arith.constant 0 : index
    %7 = vector.load %arg6[%c0_8, %c0_9] : memref<2x128xf32, #tpu.memory_space<vmem>>, vector<1x128xf32>
    %8 = vector.broadcast %7 : vector<1x128xf32> to vector<200x128xf32>
    %9 = arith.mulf %6, %8 : vector<200x128xf32>
    %c1 = arith.constant 1 : index
    %c0_10 = arith.constant 0 : index
    %10 = vector.load %arg6[%c1, %c0_10] : memref<2x128xf32, #tpu.memory_space<vmem>>, vector<1x128xf32>
    %11 = vector.broadcast %10 : vector<1x128xf32> to vector<200x128xf32>
    %12 = arith.addf %9, %11 : vector<200x128xf32>
    %cst_11 = arith.constant 0.000000e+00 : f32
    %13 = vector.broadcast %cst_11 : f32 to vector<200x128xf32>
    %14 = arith.maximumf %12, %13 : vector<200x128xf32>
    %c0_12 = arith.constant 0 : index
    %c0_13 = arith.constant 0 : index
    %15 = vector.load %arg7[%c0_12, %c0_13] : memref<200x128xf32, #tpu.memory_space<vmem>>, vector<200x128xf32>
    tpu.vector_store %arg7[%c0_12, %c0_13], %14 {strides = array<i32>} : memref<200x128xf32, #tpu.memory_space<vmem>>, vector<200x128xf32>,
    return
  }
  func.func @transform_0(%arg0: i32, %arg1: i32) -> (i32, i32) {
    %c0_i32 = arith.constant 0 : i32
    %c0_i32_0 = arith.constant 0 : i32
    return %arg0, %c0_i32 : i32, i32
  }
  func.func @transform_1(%arg0: i32, %arg1: i32) -> (i32, i32) {
    %c0_i32 = arith.constant 0 : i32
    %c0_i32_0 = arith.constant 0 : i32
    return %arg0, %c0_i32 : i32, i32
  }
  func.func @transform_2(%arg0: i32, %arg1: i32) -> (i32, i32) {
    %c0_i32 = arith.constant 0 : i32
    %c0_i32_0 = arith.constant 0 : i32
    return %c0_i32, %arg1 : i32, i32
  }
  func.func @transform_3(%arg0: i32, %arg1: i32) -> (i32, i32) {
    %c0_i32 = arith.constant 0 : i32
    %c0_i32_0 = arith.constant 0 : i32
    return %c0_i32, %arg1 : i32, i32
  }
  func.func @transform_4(%arg0: i32, %arg1: i32) -> (i32, i32) {
    %c0_i32 = arith.constant 0 : i32
    %c0_i32_0 = arith.constant 0 : i32
    return %c0_i32, %arg1 : i32, i32
  }
  func.func @transform_5(%arg0: i32, %arg1: i32) -> (i32, i32) {
    %c0_i32 = arith.constant 0 : i32
    return %arg0, %arg1 : i32, i32
  }
}

</mosaic_0001>

<bundles_post_ra>
// kernel: graph_conv_bn.1
= control target key start
LH: loop header
LB: loop body
LE: loop exit
PB: predicated region body
PF: predicated region fallthrough
CT: control target
= control target key end

     0   :  { %vm160_vm0 = vcmask 261120   ;;  %s1474_s2 = inlined_call_operand.vmem [shape: f32[160,128], index: 2, kind: input, shape index: {}]   ;;  %s1475_s3 = inlined_call_operand.vmem [shape: f32[160,128], index: 3, kind: input, shape index: {}]   ;;  %s1476_s1 = inlined_call_operand.vmem [shape: f32[200,160], index: 1, kind: input, shape index: {}]   ;;  %s1477_s0 = inlined_call_operand.vmem [shape: f32[200,160], index: 0, kind: input, shape index: {}]   ;;  %s1478_s4 = inlined_call_operand.vmem [shape: f32[2,128], index: 4, kind: input, shape index: {}]   ;;  %s1479_s5 = inlined_call_operand.vmem [shape: f32[200,128], index: 5, kind: output, shape index: {}]  }
   0x1   :  { %v85_v0 = vld [vmem:[%s1474_s2 + $0x78] sm:$0xff]  ;;  %v84_v1 = vld [vmem:[%s1474_s2 + $0x70] sm:$0xff]  ;;  %v83_v4 = vld [vmem:[%s1474_s2 + $0x68] sm:$0xff] }
   0x2   :  { %v155_v2 = vld [vmem:[%s1475_s3 + $0x78] sm:$0xff]  ;;  %495 = vmatpush.msra.mxu2 %v85_v0  ;;  %v154_v3 = vld [vmem:[%s1475_s3 + $0x70] sm:$0xff]  ;;  %v153_v5 = vld [vmem:[%s1475_s3 + $0x68] sm:$0xff] }
   0x3   :  { %236 = vmatpush.msra.mxu0 %v155_v2  ;;  %v82_v6 = vld [vmem:[%s1474_s2 + $0x60] sm:$0xff]  ;;  %v81_v8 = vld [vmem:[%s1474_s2 + $0x58] sm:$0xff]  ;;  %v80_v10 = vld [vmem:[%s1474_s2 + $0x50] sm:$0xff] }
   0x4   :  { %496 = vmatpush.msra.mxu2 %v84_v1  ;;  %v152_v7 = vld [vmem:[%s1475_s3 + $0x60] sm:$0xff]  ;;  %v151_v9 = vld [vmem:[%s1475_s3 + $0x58] sm:$0xff]  ;;  %v150_v11 = vld [vmem:[%s1475_s3 + $0x50] sm:$0xff] }
   0x5   :  { %237 = vmatpush.msra.mxu0 %v154_v3  ;;  %v89_v12 = vld [vmem:[%s1474_s2 + $0x98] sm:$0xff]  ;;  %v79_v13 = vld [vmem:[%s1474_s2 + $0x48] sm:$0xff]  ;;  %v88_v16 = vld [vmem:[%s1474_s2 + $0x90] sm:$0xff] }
   0x6   :  { %497 = vmatpush.msra.mxu2 %v83_v4  ;;  %v159_v14 = vld [vmem:[%s1475_s3 + $0x98] sm:$0xff]  ;;  %v149_v15 = vld [vmem:[%s1475_s3 + $0x48] sm:$0xff]  ;;  %599 = vmatpush.msra.mxu3 %v89_v12  ;;  %v158_v17 = vld [vmem:[%s1475_s3 + $0x90] sm:$0xff] }
   0x7   :  { %238 = vmatpush.msra.mxu0 %v153_v5  ;;  %340 = vmatpush.msra.mxu1 %v159_v14  ;;  %v87_v18 = vld [vmem:[%s1474_s2 + $0x88] sm:$0xff]  ;;  %v78_v19 = vld [vmem:[%s1474_s2 + $0x40] sm:$0xff]  ;;  %v77_v24 = vld [vmem:[%s1474_s2 + $0x38] sm:$0xff] }
   0x8   :  { %498 = vmatpush.msra.mxu2 %v82_v6  ;;  %v148_v20 = vld [vmem:[%s1475_s3 + $0x40] sm:$0xff]  ;;  %600 = vmatpush.msra.mxu3 %v88_v16  ;;  %v157_v21 = vld [vmem:[%s1475_s3 + $0x88] sm:$0xff]  ;;  %v147_v25 = vld [vmem:[%s1475_s3 + $0x38] sm:$0xff] }
   0x9   :  { %239 = vmatpush.msra.mxu0 %v152_v7  ;;  %341 = vmatpush.msra.mxu1 %v158_v17  ;;  %v86_v22 = vld [vmem:[%s1474_s2 + $0x80] sm:$0xff]  ;;  %v21_v26 = vld [vmem:[%s1477_s0 + $0x8] sm:$0xff]  ;;  %v76_v28 = vld [vmem:[%s1474_s2 + $0x30] sm:$0xff] }
   0xa   :  { %499 = vmatpush.msra.mxu2 %v81_v8  ;;  %v156_v23 = vld [vmem:[%s1475_s3 + $0x80] sm:$0xff]  ;;  %601 = vmatpush.msra.mxu3 %v87_v18  ;;  %v91_v27 = vld [vmem:[%s1476_s1 + $0x8] sm:$0xff]  ;;  %v146_v29 = vld [vmem:[%s1475_s3 + $0x30] sm:$0xff] }
   0xb   :  { %240 = vmatpush.msra.mxu0 %v151_v9  ;;  %342 = vmatpush.msra.mxu1 %v157_v21  ;;  %v75_v30 = vld [vmem:[%s1474_s2 + $0x28] sm:$0xff]  ;;  %v74_v32 = vld [vmem:[%s1474_s2 + $0x20] sm:$0xff]  ;;  %v73_v34 = vld [vmem:[%s1474_s2 + $0x18] sm:$0xff] }
   0xc   :  { %500 = vmatpush.msra.mxu2 %v80_v10  ;;  %602 = vmatpush.msra.mxu3 %v86_v22  ;;  %v145_v31 = vld [vmem:[%s1475_s3 + $0x28] sm:$0xff]  ;;  %v144_v33 = vld [vmem:[%s1475_s3 + $0x20] sm:$0xff]  ;;  %v143_v35 = vld [vmem:[%s1475_s3 + $0x18] sm:$0xff] }
   0xd   :  { %241 = vmatpush.msra.mxu0 %v150_v11  ;;  %343 = vmatpush.msra.mxu1 %v156_v23  ;;  %v23_v36 = vld [vmem:[%s1477_s0 + $0x18] sm:$0xff]  ;;  %v72_v38 = vld [vmem:[%s1474_s2 + $0x10] sm:$0xff]  ;;  %v71_v40 = vld [vmem:[%s1474_s2 + $0x8] sm:$0xff] }
   0xe   :  { %501 = vmatpush.msra.mxu2 %v79_v13  ;;  %812 = vmatmul.msk.f32.vlgmr.msra.gmra.mxu3 %vm160_vm0, %v21_v26  ;;  %v93_v37 = vld [vmem:[%s1476_s1 + $0x18] sm:$0xff]  ;;  %v142_v39 = vld [vmem:[%s1475_s3 + $0x10] sm:$0xff]  ;;  %v141_v41 = vld [vmem:[%s1475_s3 + $0x8] sm:$0xff] }
   0xf   :  { %242 = vmatpush.msra.mxu0 %v149_v15  ;;  %787 = vmatmul.msk.f32.vlgmr.msra.gmra.mxu1 %vm160_vm0, %v91_v27  ;;  %v70_v42 = vld [vmem:[%s1474_s2] sm:$0xff]  ;;  %v25_v46 = vld [vmem:[%s1477_s0 + $0x28] sm:$0xff]  ;;  %v22_v48 = vld [vmem:[%s1477_s0 + $0x10] sm:$0xff] }
  0x10   :  { %502 = vmatpush.msra.mxu2 %v78_v19  ;;  %v140_v43 = vld [vmem:[%s1475_s3] sm:$0xff]  ;;  %v95_v47 = vld [vmem:[%s1476_s1 + $0x28] sm:$0xff]  ;;  %v92_v49 = vld [vmem:[%s1476_s1 + $0x10] sm:$0xff] }
  0x11   :  { %243 = vmatpush.msra.mxu0 %v148_v20  ;;  %v20_v44 = vld [vmem:[%s1477_s0] sm:$0xff]  ;;  %v27_v50 = vld [vmem:[%s1477_s0 + $0x38] sm:$0xff]  ;;  %v29_v54 = vld [vmem:[%s1477_s0 + $0x48] sm:$0xff] }
  0x12   :  { %503 = vmatpush.msra.mxu2 %v77_v24  ;;  %v90_v45 = vld [vmem:[%s1476_s1] sm:$0xff]  ;;  %v97_v51 = vld [vmem:[%s1476_s1 + $0x38] sm:$0xff]  ;;  %v99_v55 = vld [vmem:[%s1476_s1 + $0x48] sm:$0xff] }
  0x13   :  { %244 = vmatpush.msra.mxu0 %v147_v25  ;;  %v24_v52 = vld [vmem:[%s1477_s0 + $0x20] sm:$0xff]  ;;  %v26_v56 = vld [vmem:[%s1477_s0 + $0x30] sm:$0xff]  ;;  %v31_v58 = vld [vmem:[%s1477_s0 + $0x58] sm:$0xff] }
  0x14   :  { %504 = vmatpush.msra.mxu2 %v76_v28  ;;  %v94_v53 = vld [vmem:[%s1476_s1 + $0x20] sm:$0xff]  ;;  %v96_v57 = vld [vmem:[%s1476_s1 + $0x30] sm:$0xff]  ;;  %v101_v59 = vld [vmem:[%s1476_s1 + $0x58] sm:$0xff] }
  0x15   :  { %245 = vmatpush.msra.mxu0 %v146_v29  ;;  %v28_v60 = vld [vmem:[%s1477_s0 + $0x40] sm:$0xff]  ;;  %v33_v62 = vld [vmem:[%s1477_s0 + $0x68] sm:$0xff]  ;;  %v30_v0 = vld [vmem:[%s1477_s0 + $0x50] sm:$0xff] }
  0x16   :  { %505 = vmatpush.msra.mxu2 %v75_v30  ;;  %813 = vmatmul.msk.f32.gmra.mxu3 %vm160_vm0, %v23_v36  ;;  %v98_v61 = vld [vmem:[%s1476_s1 + $0x40] sm:$0xff]  ;;  %v103_v63 = vld [vmem:[%s1476_s1 + $0x68] sm:$0xff]  ;;  %v100_v1 = vld [vmem:[%s1476_s1 + $0x50] sm:$0xff] }
  0x17   :  { %246 = vmatpush.msra.mxu0 %v145_v31  ;;  %788 = vmatmul.msk.f32.gmra.mxu1 %vm160_vm0, %v93_v37  ;;  %v35_v2 = vld [vmem:[%s1477_s0 + $0x78] sm:$0xff]  ;;  %v32_v4 = vld [vmem:[%s1477_s0 + $0x60] sm:$0xff]  ;;  %v37_v6 = vld [vmem:[%s1477_s0 + $0x88] sm:$0xff] }
  0x18   :  { %506 = vmatpush.msra.mxu2 %v74_v32  ;;  %v105_v3 = vld [vmem:[%s1476_s1 + $0x78] sm:$0xff]  ;;  %v102_v5 = vld [vmem:[%s1476_s1 + $0x60] sm:$0xff]  ;;  %v107_v7 = vld [vmem:[%s1476_s1 + $0x88] sm:$0xff] }
  0x19   :  { %247 = vmatpush.msra.mxu0 %v144_v33  ;;  %v34_v8 = vld [vmem:[%s1477_s0 + $0x70] sm:$0xff]  ;;  %v39_v10 = vld [vmem:[%s1477_s0 + $0x98] sm:$0xff]  ;;  %v36_v12 = vld [vmem:[%s1477_s0 + $0x80] sm:$0xff] }
  0x1a   :  { %507 = vmatpush.msra.mxu2 %v73_v34  ;;  %v104_v9 = vld [vmem:[%s1476_s1 + $0x70] sm:$0xff]  ;;  %v109_v11 = vld [vmem:[%s1476_s1 + $0x98] sm:$0xff]  ;;  %v106_v13 = vld [vmem:[%s1476_s1 + $0x80] sm:$0xff] }
  0x1b   :  { %248 = vmatpush.msra.mxu0 %v143_v35  ;;  %v41_v14 = vld [vmem:[%s1477_s0 + $0xa8] sm:$0xff]  ;;  %v38_v16 = vld [vmem:[%s1477_s0 + $0x90] sm:$0xff]  ;;  %v43_v18 = vld [vmem:[%s1477_s0 + $0xb8] sm:$0xff] }
  0x1c   :  { %508 = vmatpush.msra.mxu2 %v72_v38  ;;  %v111_v15 = vld [vmem:[%s1476_s1 + $0xa8] sm:$0xff]  ;;  %v108_v17 = vld [vmem:[%s1476_s1 + $0x90] sm:$0xff]  ;;  %v113_v19 = vld [vmem:[%s1476_s1 + $0xb8] sm:$0xff] }
  0x1d   :  { %249 = vmatpush.msra.mxu0 %v142_v39  ;;  %v40_v20 = vld [vmem:[%s1477_s0 + $0xa0] sm:$0xff]  ;;  %v45_v22 = vld [vmem:[%s1477_s0 + $0xc8] sm:$0xff]  ;;  %v42_v24 = vld [vmem:[%s1477_s0 + $0xb0] sm:$0xff] }
  0x1e   :  { %509 = vmatpush.msra.mxu2 %v71_v40  ;;  %814 = vmatmul.msk.f32.gmra.mxu3 %vm160_vm0, %v25_v46  ;;  %v110_v21 = vld [vmem:[%s1476_s1 + $0xa0] sm:$0xff]  ;;  %v115_v23 = vld [vmem:[%s1476_s1 + $0xc8] sm:$0xff]  ;;  %v112_v25 = vld [vmem:[%s1476_s1 + $0xb0] sm:$0xff] }
  0x1f   :  { %250 = vmatpush.msra.mxu0 %v141_v41  ;;  %789 = vmatmul.msk.f32.gmra.mxu1 %vm160_vm0, %v95_v47  ;;  %v47_v26 = vld [vmem:[%s1477_s0 + $0xd8] sm:$0xff]  ;;  %v44_v28 = vld [vmem:[%s1477_s0 + $0xc0] sm:$0xff]  ;;  %v49_v30 = vld [vmem:[%s1477_s0 + $0xe8] sm:$0xff] }
  0x20   :  { %510 = vmatpush.msra.mxu2 %v70_v42  ;;  %v117_v27 = vld [vmem:[%s1476_s1 + $0xd8] sm:$0xff]  ;;  %v114_v29 = vld [vmem:[%s1476_s1 + $0xc0] sm:$0xff]  ;;  %v119_v31 = vld [vmem:[%s1476_s1 + $0xe8] sm:$0xff] }
  0x21   :  { %251 = vmatpush.msra.mxu0 %v140_v43  ;;  %511 = vmatmul.f32.vlgmr.msra.gmra.mxu2 %v20_v44  ;;  %v46_v32 = vld [vmem:[%s1477_s0 + $0xd0] sm:$0xff]  ;;  %v51_v34 = vld [vmem:[%s1477_s0 + $0xf8] sm:$0xff]  ;;  %v48_v36 = vld [vmem:[%s1477_s0 + $0xe0] sm:$0xff] }
  0x22   :  { %252 = vmatmul.f32.vlgmr.msra.gmra.mxu0 %v90_v45  ;;  %v116_v33 = vld [vmem:[%s1476_s1 + $0xd0] sm:$0xff]  ;;  %v121_v35 = vld [vmem:[%s1476_s1 + $0xf8] sm:$0xff]  ;;  %v118_v37 = vld [vmem:[%s1476_s1 + $0xe0] sm:$0xff] }
  0x23   :  { %v53_v39 = vld [vmem:[%s1477_s0 + $0x108] sm:$0xff]  ;;  %v50_v41 = vld [vmem:[%s1477_s0 + $0xf0] sm:$0xff]  ;;  %v55_v45 = vld [vmem:[%s1477_s0 + $0x118] sm:$0xff] }
  0x24   :  { %v123_v40 = vld [vmem:[%s1476_s1 + $0x108] sm:$0xff]  ;;  %v120_v42 = vld [vmem:[%s1476_s1 + $0xf0] sm:$0xff]  ;;  %v125_v46 = vld [vmem:[%s1476_s1 + $0x118] sm:$0xff] }
  0x25   :  { %v52_v47 = vld [vmem:[%s1477_s0 + $0x100] sm:$0xff] }
  0x26   :  { %815 = vmatmul.msk.f32.gmra.mxu3 %vm160_vm0, %v27_v50 }
  0x27   :  { %790 = vmatmul.msk.f32.gmra.mxu1 %vm160_vm0, %v97_v51 }
  0x29   :  { %514 = vmatmul.f32.gmra.mxu2 %v22_v48 }
  0x2a   :  { %255 = vmatmul.f32.gmra.mxu0 %v92_v49  ;;  %v122_v49 = vld [vmem:[%s1476_s1 + $0x100] sm:$0xff] }
  0x2e   :  { %816 = vmatmul.msk.f32.gmra.mxu3 %vm160_vm0, %v29_v54 }
  0x2f   :  { %791 = vmatmul.msk.f32.gmra.mxu1 %vm160_vm0, %v99_v55 }
  0x31   :  { %517 = vmatmul.f32.gmra.mxu2 %v24_v52  ;;  %v57_v52 = vld [vmem:[%s1477_s0 + $0x128] sm:$0xff] }
  0x32   :  { %258 = vmatmul.f32.gmra.mxu0 %v94_v53  ;;  %v127_v53 = vld [vmem:[%s1476_s1 + $0x128] sm:$0xff] }
  0x36   :  { %817 = vmatmul.msk.f32.gmra.mxu3 %vm160_vm0, %v31_v58  ;;  %v54_v58 = vld [vmem:[%s1477_s0 + $0x110] sm:$0xff] }
  0x37   :  { %792 = vmatmul.msk.f32.gmra.mxu1 %vm160_vm0, %v101_v59 }
  0x39   :  { %520 = vmatmul.f32.gmra.mxu2 %v26_v56 }
  0x3a   :  { %261 = vmatmul.f32.gmra.mxu0 %v96_v57  ;;  %v1246_v57 = vld [vmem:[%s1478_s4] ss:$0 sm:$0xff] }
  0x3e   :  { %818 = vmatmul.msk.f32.gmra.mxu3 %vm160_vm0, %v33_v62 }
  0x3f   :  { %793 = vmatmul.msk.f32.gmra.mxu1 %vm160_vm0, %v103_v63  ;;  %v1257_v63 = vld [vmem:[%s1478_s4 + $0x1] ss:$0 sm:$0xff] }
  0x41   :  { %523 = vmatmul.f32.gmra.mxu2 %v28_v60  ;;  %v124_v60 = vld [vmem:[%s1476_s1 + $0x110] sm:$0xff] }
  0x42   :  { %264 = vmatmul.f32.gmra.mxu0 %v98_v61 }
  0x46   :  { %819 = vmatmul.msk.f32.gmra.mxu3 %vm160_vm0, %v35_v2  ;;  %v129_v2 = vld [vmem:[%s1476_s1 + $0x138] sm:$0xff] }
  0x47   :  { %794 = vmatmul.msk.f32.gmra.mxu1 %vm160_vm0, %v105_v3 }
  0x49   :  { %526 = vmatmul.f32.gmra.mxu2 %v30_v0 }
  0x4a   :  { %267 = vmatmul.f32.gmra.mxu0 %v100_v1  ;;  %v59_v1 = vld [vmem:[%s1477_s0 + $0x138] sm:$0xff] }
  0x4e   :  { %820 = vmatmul.msk.f32.gmra.mxu3 %vm160_vm0, %v37_v6 }
  0x4f   :  { %795 = vmatmul.msk.f32.gmra.mxu1 %vm160_vm0, %v107_v7 }
  0x51   :  { %529 = vmatmul.f32.gmra.mxu2 %v32_v4 }
  0x52   :  { %270 = vmatmul.f32.gmra.mxu0 %v102_v5 }
  0x56   :  { %821 = vmatmul.msk.f32.gmra.mxu3 %vm160_vm0, %v39_v10 }
  0x57   :  { %796 = vmatmul.msk.f32.gmra.mxu1 %vm160_vm0, %v109_v11  ;;  %v126_v11 = vld [vmem:[%s1476_s1 + $0x120] sm:$0xff] }
  0x59   :  { %532 = vmatmul.f32.gmra.mxu2 %v34_v8 }
  0x5a   :  { %273 = vmatmul.f32.gmra.mxu0 %v104_v9  ;;  %v56_v9 = vld [vmem:[%s1477_s0 + $0x120] sm:$0xff] }
  0x5e   :  { %822 = vmatmul.msk.f32.gmra.mxu3 %vm160_vm0, %v41_v14 }
  0x5f   :  { %797 = vmatmul.msk.f32.gmra.mxu1 %vm160_vm0, %v111_v15  ;;  %v61_v15 = vld [vmem:[%s1477_s0 + $0x148] sm:$0xff] }
  0x61   :  { %535 = vmatmul.f32.gmra.mxu2 %v36_v12 }
  0x62   :  { %276 = vmatmul.f32.gmra.mxu0 %v106_v13 }
  0x66   :  { %823 = vmatmul.msk.f32.gmra.mxu3 %vm160_vm0, %v43_v18 }
  0x67   :  { %798 = vmatmul.msk.f32.gmra.mxu1 %vm160_vm0, %v113_v19 }
  0x69   :  { %538 = vmatmul.f32.gmra.mxu2 %v38_v16  ;;  %v131_v16 = vld [vmem:[%s1476_s1 + $0x148] sm:$0xff] }
  0x6a   :  { %279 = vmatmul.f32.gmra.mxu0 %v108_v17 }
  0x6e   :  { %824 = vmatmul.msk.f32.gmra.mxu3 %vm160_vm0, %v45_v22 }
  0x6f   :  { %799 = vmatmul.msk.f32.gmra.mxu1 %vm160_vm0, %v115_v23  ;;  %v58_v23 = vld [vmem:[%s1477_s0 + $0x130] sm:$0xff] }
  0x71   :  { %541 = vmatmul.f32.gmra.mxu2 %v40_v20 }
  0x72   :  { %282 = vmatmul.f32.gmra.mxu0 %v110_v21 }
  0x76   :  { %825 = vmatmul.msk.f32.gmra.mxu3 %vm160_vm0, %v47_v26 }
  0x77   :  { %800 = vmatmul.msk.f32.gmra.mxu1 %vm160_vm0, %v117_v27 }
  0x79   :  { %544 = vmatmul.f32.gmra.mxu2 %v42_v24 }
  0x7a   :  { %285 = vmatmul.f32.gmra.mxu0 %v112_v25  ;;  %v128_v25 = vld [vmem:[%s1476_s1 + $0x130] sm:$0xff] }
  0x7e   :  { %826 = vmatmul.msk.f32.gmra.mxu3 %vm160_vm0, %v49_v30  ;;  %v133_v30 = vld [vmem:[%s1476_s1 + $0x158] sm:$0xff] }
  0x7f   :  { %801 = vmatmul.msk.f32.gmra.mxu1 %vm160_vm0, %v119_v31 }
  0x81   :  { %547 = vmatmul.f32.gmra.mxu2 %v44_v28 }
  0x82   :  { %288 = vmatmul.f32.gmra.mxu0 %v114_v29  ;;  %v63_v29 = vld [vmem:[%s1477_s0 + $0x158] sm:$0xff] }
  0x86   :  { %827 = vmatmul.msk.f32.gmra.mxu3 %vm160_vm0, %v51_v34 }
  0x87   :  { %802 = vmatmul.msk.f32.gmra.mxu1 %vm160_vm0, %v121_v35 }
  0x89   :  { %550 = vmatmul.f32.gmra.mxu2 %v46_v32 }
  0x8a   :  { %291 = vmatmul.f32.gmra.mxu0 %v116_v33 }
  0x8c   :  { %v345_v38 = vpop.f32.mrf.mxu1 }
  0x8e   :  { %828 = vmatmul.msk.f32.gmra.mxu3 %vm160_vm0, %v53_v39  ;;  %v130_v39 = vld [vmem:[%s1476_s1 + $0x140] sm:$0xff] }
  0x8f   :  { %803 = vmatmul.msk.f32.gmra.mxu1 %vm160_vm0, %v123_v40 }
  0x91   :  { %553 = vmatmul.f32.gmra.mxu2 %v48_v36  ;;  %v604_v43 = vpop.f32.mrf.mxu3 }
  0x92   :  { %294 = vmatmul.f32.gmra.mxu0 %v118_v37  ;;  %v60_v37 = vld [vmem:[%s1477_s0 + $0x140] sm:$0xff] }
  0x94   :  { %v348_v44 = vpop.f32.mrf.mxu1 }
  0x96   :  { %829 = vmatmul.msk.f32.gmra.mxu3 %vm160_vm0, %v55_v45 }
  0x97   :  { %804 = vmatmul.msk.f32.gmra.mxu1 %vm160_vm0, %v125_v46 }
  0x99   :  { %556 = vmatmul.f32.gmra.mxu2 %v50_v41  ;;  %v607_v50 = vpop.f32.mrf.mxu3 }
  0x9a   :  { %297 = vmatmul.f32.gmra.mxu0 %v120_v42 }
  0x9c   :  { %v351_v51 = vpop.f32.mrf.mxu1 }
  0x9e   :  { %830 = vmatmul.msk.f32.gmra.mxu3 %vm160_vm0, %v57_v52 }
  0x9f   :  { %v253_v48 = vpop.f32.mrf.mxu0  ;;  %805 = vmatmul.msk.f32.gmra.mxu1 %vm160_vm0, %v127_v53  ;;  %v132_v53 = vld [vmem:[%s1476_s1 + $0x150] sm:$0xff] }
  0xa0   :  { %v346_v54 = vadd.f32 %v345_v38, %v253_v48 }
  0xa1   :  { %559 = vmatmul.f32.gmra.mxu2 %v52_v47  ;;  %v610_v61 = vpop.f32.mrf.mxu3 }
  0xa2   :  { %300 = vmatmul.f32.gmra.mxu0 %v122_v49 }
  0xa4   :  { %v512_v55 = vpop.f32.mrf.mxu2  ;;  %v354_v0 = vpop.f32.mrf.mxu1 }
  0xa5   :  { %v513_v56 = vadd.f32 %v512_v55, %v346_v54 }
  0xa6   :  { %831 = vmatmul.msk.f32.gmra.mxu3 %vm160_vm0, %v59_v1 }
  0xa7   :  { %v256_v59 = vpop.f32.mrf.mxu0  ;;  %v605_v62 = vadd.f32 %v604_v43, %v513_v56  ;;  %806 = vmatmul.msk.f32.gmra.mxu1 %vm160_vm0, %v129_v2  ;;  %v65_v43 = vld [vmem:[%s1477_s0 + $0x168] sm:$0xff] }
  0xa8   :  { %v349_v4 = vadd.f32 %v348_v44, %v256_v59  ;;  %v135_v44 = vld [vmem:[%s1476_s1 + $0x168] sm:$0xff]  ;;  %v137_v59 = vld [vmem:[%s1476_s1 + $0x178] sm:$0xff] }
  0xa9   :  { %v681_v3 = vmul.f32 %v1246_v57, %v605_v62  ;;  %562 = vmatmul.f32.gmra.mxu2 %v54_v58  ;;  %v613_v12 = vpop.f32.mrf.mxu3  ;;  %v67_v58 = vld [vmem:[%s1477_s0 + $0x178] sm:$0xff] }
  0xaa   :  { %303 = vmatmul.f32.gmra.mxu0 %v124_v60 }
  0xab   :  { %v708_v5 = vadd.f32 %v1257_v63, %v681_v3  ;;  %v64_v3 = vld [vmem:[%s1477_s0 + $0x160] sm:$0xff] }
  0xac   :  { %v515_v6 = vpop.f32.mrf.mxu2  ;;  %v357_v14 = vpop.f32.mrf.mxu1 }
  0xad   :  { %v733_v7 = vmax.f32 %v708_v5, 0.0  ;;  %v516_v8 = vadd.f32 %v515_v6, %v349_v4  ;;  %v134_v5 = vld [vmem:[%s1476_s1 + $0x160] sm:$0xff] }
  0xae   :  { %832 = vmatmul.msk.f32.gmra.mxu3 %vm160_vm0, %v61_v15 }
  0xaf   :  { %v259_v10 = vpop.f32.mrf.mxu0  ;;  %758 = vst [vmem:[%s1479_s5] sm:$0xff] %v733_v7  ;;  %v608_v13 = vadd.f32 %v607_v50, %v516_v8  ;;  %807 = vmatmul.msk.f32.gmra.mxu1 %vm160_vm0, %v131_v16 }
  0xb0   :  { %v352_v18 = vadd.f32 %v351_v51, %v259_v10  ;;  %v62_v51 = vld [vmem:[%s1477_s0 + $0x150] sm:$0xff]  ;;  %v139_v10 = vld [vmem:[%s1476_s1 + $0x188] sm:$0xff] }
  0xb1   :  { %v682_v17 = vmul.f32 %v1246_v57, %v608_v13  ;;  %565 = vmatmul.f32.gmra.mxu2 %v56_v9  ;;  %v616_v26 = vpop.f32.mrf.mxu3  ;;  %v69_v9 = vld [vmem:[%s1477_s0 + $0x188] sm:$0xff] }
  0xb2   :  { %306 = vmatmul.f32.gmra.mxu0 %v126_v11 }
  0xb3   :  { %v709_v19 = vadd.f32 %v1257_v63, %v682_v17  ;;  %v66_v17 = vld [vmem:[%s1477_s0 + $0x170] sm:$0xff] }
  0xb4   :  { %v518_v20 = vpop.f32.mrf.mxu2  ;;  %v360_v28 = vpop.f32.mrf.mxu1 }
  0xb5   :  { %v734_v21 = vmax.f32 %v709_v19, 0.0  ;;  %v519_v22 = vadd.f32 %v518_v20, %v352_v18  ;;  %v136_v19 = vld [vmem:[%s1476_s1 + $0x170] sm:$0xff] }
  0xb6   :  { %833 = vmatmul.msk.f32.gmra.mxu3 %vm160_vm0, %v63_v29  ;;  %v68_v29 = vld [vmem:[%s1477_s0 + $0x180] sm:$0xff] }
  0xb7   :  { %v262_v24 = vpop.f32.mrf.mxu0  ;;  %759 = vst [vmem:[%s1479_s5 + $0x8] sm:$0xff] %v734_v21  ;;  %v611_v27 = vadd.f32 %v610_v61, %v519_v22  ;;  %808 = vmatmul.msk.f32.gmra.mxu1 %vm160_vm0, %v133_v30 }
  0xb8   :  { %v355_v32 = vadd.f32 %v354_v0, %v262_v24 }
  0xb9   :  { %v683_v31 = vmul.f32 %v1246_v57, %v611_v27  ;;  %568 = vmatmul.f32.gmra.mxu2 %v58_v23  ;;  %v619_v40 = vpop.f32.mrf.mxu3 }
  0xba   :  { %309 = vmatmul.f32.gmra.mxu0 %v128_v25 }
  0xbb   :  { %v710_v33 = vadd.f32 %v1257_v63, %v683_v31  ;;  %v138_v31 = vld [vmem:[%s1476_s1 + $0x180] sm:$0xff] }
  0xbc   :  { %v521_v34 = vpop.f32.mrf.mxu2  ;;  %v363_v42 = vpop.f32.mrf.mxu1 }
  0xbd   :  { %v735_v35 = vmax.f32 %v710_v33, 0.0  ;;  %v522_v36 = vadd.f32 %v521_v34, %v355_v32 }
  0xbe   :  { %834 = vmatmul.msk.f32.gmra.mxu3 %vm160_vm0, %v65_v43 }
  0xbf   :  { %v265_v38 = vpop.f32.mrf.mxu0  ;;  %760 = vst [vmem:[%s1479_s5 + $0x10] sm:$0xff] %v735_v35  ;;  %v614_v41 = vadd.f32 %v613_v12, %v522_v36  ;;  %809 = vmatmul.msk.f32.gmra.mxu1 %vm160_vm0, %v135_v44 }
  0xc0   :  { %v358_v46 = vadd.f32 %v357_v14, %v265_v38 }
  0xc1   :  { %v684_v45 = vmul.f32 %v1246_v57, %v614_v41  ;;  %571 = vmatmul.f32.gmra.mxu2 %v60_v37  ;;  %v622_v54 = vpop.f32.mrf.mxu3 }
  0xc2   :  { %312 = vmatmul.f32.gmra.mxu0 %v130_v39 }
  0xc3   :  { %v711_v47 = vadd.f32 %v1257_v63, %v684_v45 }
  0xc4   :  { %v524_v48 = vpop.f32.mrf.mxu2  ;;  %v366_v56 = vpop.f32.mrf.mxu1 }
  0xc5   :  { %v736_v49 = vmax.f32 %v711_v47, 0.0  ;;  %v525_v50 = vadd.f32 %v524_v48, %v358_v46 }
  0xc6   :  { %835 = vmatmul.msk.f32.gmra.mxu3 %vm160_vm0, %v67_v58 }
  0xc7   :  { %v268_v52 = vpop.f32.mrf.mxu0  ;;  %761 = vst [vmem:[%s1479_s5 + $0x18] sm:$0xff] %v736_v49  ;;  %v617_v55 = vadd.f32 %v616_v26, %v525_v50  ;;  %810 = vmatmul.msk.f32.gmra.mxu1 %vm160_vm0, %v137_v59 }
  0xc8   :  { %v361_v61 = vadd.f32 %v360_v28, %v268_v52 }
  0xc9   :  { %v685_v60 = vmul.f32 %v1246_v57, %v617_v55  ;;  %574 = vmatmul.f32.gmra.mxu2 %v62_v51  ;;  %v625_v6 = vpop.f32.mrf.mxu3 }
  0xca   :  { %315 = vmatmul.f32.gmra.mxu0 %v132_v53 }
  0xcb   :  { %v712_v62 = vadd.f32 %v1257_v63, %v685_v60 }
  0xcc   :  { %v527_v0 = vpop.f32.mrf.mxu2  ;;  %v369_v8 = vpop.f32.mrf.mxu1 }
  0xcd   :  { %v737_v1 = vmax.f32 %v712_v62, 0.0  ;;  %v528_v2 = vadd.f32 %v527_v0, %v361_v61 }
  0xce   :  { %836 = vmatmul.msk.f32.gmra.mxu3 %vm160_vm0, %v69_v9 }
  0xcf   :  { %v271_v4 = vpop.f32.mrf.mxu0  ;;  %762 = vst [vmem:[%s1479_s5 + $0x20] sm:$0xff] %v737_v1  ;;  %v620_v7 = vadd.f32 %v619_v40, %v528_v2  ;;  %811 = vmatmul.msk.f32.gmra.mxu1 %vm160_vm0, %v139_v10 }
  0xd0   :  { %v364_v12 = vadd.f32 %v363_v42, %v271_v4 }
  0xd1   :  { %v686_v11 = vmul.f32 %v1246_v57, %v620_v7  ;;  %577 = vmatmul.f32.gmra.mxu2 %v64_v3  ;;  %v628_v20 = vpop.f32.mrf.mxu3 }
  0xd2   :  { %318 = vmatmul.f32.gmra.mxu0 %v134_v5 }
  0xd3   :  { %v713_v13 = vadd.f32 %v1257_v63, %v686_v11 }
  0xd4   :  { %v530_v14 = vpop.f32.mrf.mxu2  ;;  %v372_v22 = vpop.f32.mrf.mxu1 }
  0xd5   :  { %v738_v15 = vmax.f32 %v713_v13, 0.0  ;;  %v531_v16 = vadd.f32 %v530_v14, %v364_v12 }
  0xd7   :  { %v274_v18 = vpop.f32.mrf.mxu0  ;;  %763 = vst [vmem:[%s1479_s5 + $0x28] sm:$0xff] %v738_v15  ;;  %v623_v21 = vadd.f32 %v622_v54, %v531_v16 }
  0xd8   :  { %v367_v24 = vadd.f32 %v366_v56, %v274_v18 }
  0xd9   :  { %v687_v23 = vmul.f32 %v1246_v57, %v623_v21  ;;  %580 = vmatmul.f32.gmra.mxu2 %v66_v17  ;;  %v631_v32 = vpop.f32.mrf.mxu3 }
  0xda   :  { %321 = vmatmul.f32.gmra.mxu0 %v136_v19 }
  0xdb   :  { %v714_v25 = vadd.f32 %v1257_v63, %v687_v23 }
  0xdc   :  { %v533_v26 = vpop.f32.mrf.mxu2  ;;  %v375_v34 = vpop.f32.mrf.mxu1 }
  0xdd   :  { %v739_v27 = vmax.f32 %v714_v25, 0.0  ;;  %v534_v28 = vadd.f32 %v533_v26, %v367_v24 }
  0xdf   :  { %v277_v30 = vpop.f32.mrf.mxu0  ;;  %764 = vst [vmem:[%s1479_s5 + $0x30] sm:$0xff] %v739_v27  ;;  %v626_v33 = vadd.f32 %v625_v6, %v534_v28 }
  0xe0   :  { %v370_v36 = vadd.f32 %v369_v8, %v277_v30 }
  0xe1   :  { %v688_v35 = vmul.f32 %v1246_v57, %v626_v33  ;;  %583 = vmatmul.f32.gmra.mxu2 %v68_v29  ;;  %v634_v42 = vpop.f32.mrf.mxu3 }
  0xe2   :  { %324 = vmatmul.f32.gmra.mxu0 %v138_v31 }
  0xe3   :  { %v715_v37 = vadd.f32 %v1257_v63, %v688_v35 }
  0xe4   :  { %v536_v38 = vpop.f32.mrf.mxu2  ;;  %v378_v44 = vpop.f32.mrf.mxu1 }
  0xe5   :  { %v740_v39 = vmax.f32 %v715_v37, 0.0  ;;  %v537_v40 = vadd.f32 %v536_v38, %v370_v36 }
  0xe7   :  { %v280_v41 = vpop.f32.mrf.mxu0  ;;  %765 = vst [vmem:[%s1479_s5 + $0x38] sm:$0xff] %v740_v39  ;;  %v629_v43 = vadd.f32 %v628_v20, %v537_v40 }
  0xe8   :  { %v373_v46 = vadd.f32 %v372_v22, %v280_v41 }
  0xe9   :  { %v689_v45 = vmul.f32 %v1246_v57, %v629_v43  ;;  %v637_v52 = vpop.f32.mrf.mxu3 }
  0xeb   :  { %v716_v47 = vadd.f32 %v1257_v63, %v689_v45 }
  0xec   :  { %v539_v48 = vpop.f32.mrf.mxu2  ;;  %v381_v54 = vpop.f32.mrf.mxu1 }
  0xed   :  { %v741_v49 = vmax.f32 %v716_v47, 0.0  ;;  %v540_v50 = vadd.f32 %v539_v48, %v373_v46 }
  0xef   :  { %v283_v51 = vpop.f32.mrf.mxu0  ;;  %766 = vst [vmem:[%s1479_s5 + $0x40] sm:$0xff] %v741_v49  ;;  %v632_v53 = vadd.f32 %v631_v32, %v540_v50 }
  0xf0   :  { %v376_v56 = vadd.f32 %v375_v34, %v283_v51 }
  0xf1   :  { %v690_v55 = vmul.f32 %v1246_v57, %v632_v53  ;;  %v640_v0 = vpop.f32.mrf.mxu3 }
  0xf3   :  { %v717_v58 = vadd.f32 %v1257_v63, %v690_v55 }
  0xf4   :  { %v542_v59 = vpop.f32.mrf.mxu2  ;;  %v384_v2 = vpop.f32.mrf.mxu1 }
  0xf5   :  { %v742_v60 = vmax.f32 %v717_v58, 0.0  ;;  %v543_v61 = vadd.f32 %v542_v59, %v376_v56 }
  0xf7   :  { %v286_v62 = vpop.f32.mrf.mxu0  ;;  %767 = vst [vmem:[%s1479_s5 + $0x48] sm:$0xff] %v742_v60  ;;  %v635_v1 = vadd.f32 %v634_v42, %v543_v61 }
  0xf8   :  { %v379_v4 = vadd.f32 %v378_v44, %v286_v62 }
  0xf9   :  { %v691_v3 = vmul.f32 %v1246_v57, %v635_v1  ;;  %v643_v10 = vpop.f32.mrf.mxu3 }
  0xfb   :  { %v718_v5 = vadd.f32 %v1257_v63, %v691_v3 }
  0xfc   :  { %v545_v6 = vpop.f32.mrf.mxu2  ;;  %v387_v12 = vpop.f32.mrf.mxu1 }
  0xfd   :  { %v743_v7 = vmax.f32 %v718_v5, 0.0  ;;  %v546_v8 = vadd.f32 %v545_v6, %v379_v4 }
  0xff   :  { %v289_v9 = vpop.f32.mrf.mxu0  ;;  %768 = vst [vmem:[%s1479_s5 + $0x50] sm:$0xff] %v743_v7  ;;  %v638_v11 = vadd.f32 %v637_v52, %v546_v8 }
 0x100   :  { %v382_v14 = vadd.f32 %v381_v54, %v289_v9 }
 0x101   :  { %v692_v13 = vmul.f32 %v1246_v57, %v638_v11  ;;  %v646_v20 = vpop.f32.mrf.mxu3 }
 0x103   :  { %v719_v15 = vadd.f32 %v1257_v63, %v692_v13 }
 0x104   :  { %v548_v16 = vpop.f32.mrf.mxu2  ;;  %v390_v22 = vpop.f32.mrf.mxu1 }
 0x105   :  { %v744_v17 = vmax.f32 %v719_v15, 0.0  ;;  %v549_v18 = vadd.f32 %v548_v16, %v382_v14 }
 0x107   :  { %v292_v19 = vpop.f32.mrf.mxu0  ;;  %769 = vst [vmem:[%s1479_s5 + $0x58] sm:$0xff] %v744_v17  ;;  %v641_v21 = vadd.f32 %v640_v0, %v549_v18 }
 0x108   :  { %v385_v24 = vadd.f32 %v384_v2, %v292_v19 }
 0x109   :  { %v693_v23 = vmul.f32 %v1246_v57, %v641_v21  ;;  %v649_v30 = vpop.f32.mrf.mxu3 }
 0x10b   :  { %v720_v25 = vadd.f32 %v1257_v63, %v693_v23 }
 0x10c   :  { %v551_v26 = vpop.f32.mrf.mxu2  ;;  %v393_v32 = vpop.f32.mrf.mxu1 }
 0x10d   :  { %v745_v27 = vmax.f32 %v720_v25, 0.0  ;;  %v552_v28 = vadd.f32 %v551_v26, %v385_v24 }
 0x10f   :  { %v295_v29 = vpop.f32.mrf.mxu0  ;;  %770 = vst [vmem:[%s1479_s5 + $0x60] sm:$0xff] %v745_v27  ;;  %v644_v31 = vadd.f32 %v643_v10, %v552_v28 }
 0x110   :  { %v388_v34 = vadd.f32 %v387_v12, %v295_v29 }
 0x111   :  { %v694_v33 = vmul.f32 %v1246_v57, %v644_v31  ;;  %v652_v40 = vpop.f32.mrf.mxu3 }
 0x113   :  { %v721_v35 = vadd.f32 %v1257_v63, %v694_v33 }
 0x114   :  { %v554_v36 = vpop.f32.mrf.mxu2  ;;  %v396_v42 = vpop.f32.mrf.mxu1 }
 0x115   :  { %v746_v37 = vmax.f32 %v721_v35, 0.0  ;;  %v555_v38 = vadd.f32 %v554_v36, %v388_v34 }
 0x117   :  { %v298_v39 = vpop.f32.mrf.mxu0  ;;  %771 = vst [vmem:[%s1479_s5 + $0x68] sm:$0xff] %v746_v37  ;;  %v647_v41 = vadd.f32 %v646_v20, %v555_v38 }
 0x118   :  { %v391_v44 = vadd.f32 %v390_v22, %v298_v39 }
 0x119   :  { %v695_v43 = vmul.f32 %v1246_v57, %v647_v41  ;;  %v655_v50 = vpop.f32.mrf.mxu3 }
 0x11b   :  { %v722_v45 = vadd.f32 %v1257_v63, %v695_v43 }
 0x11c   :  { %v557_v46 = vpop.f32.mrf.mxu2  ;;  %v399_v54 = vpop.f32.mrf.mxu1 }
 0x11d   :  { %v747_v47 = vmax.f32 %v722_v45, 0.0  ;;  %v558_v48 = vadd.f32 %v557_v46, %v391_v44 }
 0x11f   :  { %v301_v49 = vpop.f32.mrf.mxu0  ;;  %772 = vst [vmem:[%s1479_s5 + $0x70] sm:$0xff] %v747_v47  ;;  %v650_v51 = vadd.f32 %v649_v30, %v558_v48 }
 0x120   :  { %v394_v53 = vadd.f32 %v393_v32, %v301_v49 }
 0x121   :  { %v696_v52 = vmul.f32 %v1246_v57, %v650_v51  ;;  %v658_v62 = vpop.f32.mrf.mxu3 }
 0x123   :  { %v723_v55 = vadd.f32 %v1257_v63, %v696_v52 }
 0x124   :  { %v560_v56 = vpop.f32.mrf.mxu2  ;;  %v402_v4 = vpop.f32.mrf.mxu1 }
 0x125   :  { %v748_v58 = vmax.f32 %v723_v55, 0.0  ;;  %v561_v59 = vadd.f32 %v560_v56, %v394_v53 }
 0x127   :  { %v304_v60 = vpop.f32.mrf.mxu0  ;;  %773 = vst [vmem:[%s1479_s5 + $0x78] sm:$0xff] %v748_v58  ;;  %v653_v61 = vadd.f32 %v652_v40, %v561_v59 }
 0x128   :  { %v397_v1 = vadd.f32 %v396_v42, %v304_v60 }
 0x129   :  { %v697_v0 = vmul.f32 %v1246_v57, %v653_v61  ;;  %v661_v11 = vpop.f32.mrf.mxu3 }
 0x12b   :  { %v724_v2 = vadd.f32 %v1257_v63, %v697_v0 }
 0x12c   :  { %v563_v3 = vpop.f32.mrf.mxu2  ;;  %v405_v17 = vpop.f32.mrf.mxu1 }
 0x12d   :  { %v749_v5 = vmax.f32 %v724_v2, 0.0  ;;  %v564_v6 = vadd.f32 %v563_v3, %v397_v1 }
 0x12f   :  { %v307_v7 = vpop.f32.mrf.mxu0  ;;  %774 = vst [vmem:[%s1479_s5 + $0x80] sm:$0xff] %v749_v5  ;;  %v656_v8 = vadd.f32 %v655_v50, %v564_v6 }
 0x130   :  { %v400_v10 = vadd.f32 %v399_v54, %v307_v7 }
 0x131   :  { %v698_v9 = vmul.f32 %v1246_v57, %v656_v8  ;;  %v664_v23 = vpop.f32.mrf.mxu3 }
 0x133   :  { %v725_v12 = vadd.f32 %v1257_v63, %v698_v9 }
 0x134   :  { %v566_v13 = vpop.f32.mrf.mxu2  ;;  %v408_v28 = vpop.f32.mrf.mxu1 }
 0x135   :  { %v750_v14 = vmax.f32 %v725_v12, 0.0  ;;  %v567_v15 = vadd.f32 %v566_v13, %v400_v10 }
 0x137   :  { %v310_v16 = vpop.f32.mrf.mxu0  ;;  %775 = vst [vmem:[%s1479_s5 + $0x88] sm:$0xff] %v750_v14  ;;  %v659_v18 = vadd.f32 %v658_v62, %v567_v15 }
 0x138   :  { %v403_v20 = vadd.f32 %v402_v4, %v310_v16 }
 0x139   :  { %v699_v19 = vmul.f32 %v1246_v57, %v659_v18  ;;  %v667_v36 = vpop.f32.mrf.mxu3 }
 0x13b   :  { %v726_v21 = vadd.f32 %v1257_v63, %v699_v19 }
 0x13c   :  { %v569_v22 = vpop.f32.mrf.mxu2  ;;  %v411_v40 = vpop.f32.mrf.mxu1 }
 0x13d   :  { %v751_v24 = vmax.f32 %v726_v21, 0.0  ;;  %v570_v25 = vadd.f32 %v569_v22, %v403_v20 }
 0x13f   :  { %v313_v26 = vpop.f32.mrf.mxu0  ;;  %776 = vst [vmem:[%s1479_s5 + $0x90] sm:$0xff] %v751_v24  ;;  %v662_v27 = vadd.f32 %v661_v11, %v570_v25 }
 0x140   :  { %v406_v30 = vadd.f32 %v405_v17, %v313_v26 }
 0x141   :  { %v700_v29 = vmul.f32 %v1246_v57, %v662_v27  ;;  %v670_v47 = vpop.f32.mrf.mxu3 }
 0x143   :  { %v727_v31 = vadd.f32 %v1257_v63, %v700_v29 }
 0x144   :  { %v572_v32 = vpop.f32.mrf.mxu2  ;;  %v414_v52 = vpop.f32.mrf.mxu1 }
 0x145   :  { %v752_v33 = vmax.f32 %v727_v31, 0.0  ;;  %v573_v34 = vadd.f32 %v572_v32, %v406_v30 }
 0x147   :  { %v316_v35 = vpop.f32.mrf.mxu0  ;;  %777 = vst [vmem:[%s1479_s5 + $0x98] sm:$0xff] %v752_v33  ;;  %v665_v37 = vadd.f32 %v664_v23, %v573_v34 }
 0x148   :  { %v409_v39 = vadd.f32 %v408_v28, %v316_v35 }
 0x149   :  { %v701_v38 = vmul.f32 %v1246_v57, %v665_v37  ;;  %v673_v60 = vpop.f32.mrf.mxu3 }
 0x14b   :  { %v728_v41 = vadd.f32 %v1257_v63, %v701_v38 }
 0x14c   :  { %v575_v42 = vpop.f32.mrf.mxu2  ;;  %v417_v3 = vpop.f32.mrf.mxu1 }
 0x14d   :  { %v753_v43 = vmax.f32 %v728_v41, 0.0  ;;  %v576_v44 = vadd.f32 %v575_v42, %v409_v39 }
 0x14f   :  { %v319_v45 = vpop.f32.mrf.mxu0  ;;  %778 = vst [vmem:[%s1479_s5 + $0xa0] sm:$0xff] %v753_v43  ;;  %v668_v46 = vadd.f32 %v667_v36, %v576_v44 }
 0x150   :  { %v412_v49 = vadd.f32 %v411_v40, %v319_v45 }
 0x151   :  { %v702_v48 = vmul.f32 %v1246_v57, %v668_v46  ;;  %v676_v9 = vpop.f32.mrf.mxu3 }
 0x153   :  { %v729_v50 = vadd.f32 %v1257_v63, %v702_v48 }
 0x154   :  { %v578_v51 = vpop.f32.mrf.mxu2 }
 0x155   :  { %v754_v53 = vmax.f32 %v729_v50, 0.0  ;;  %v579_v54 = vadd.f32 %v578_v51, %v412_v49 }
 0x157   :  { %v322_v55 = vpop.f32.mrf.mxu0  ;;  %779 = vst [vmem:[%s1479_s5 + $0xa8] sm:$0xff] %v754_v53  ;;  %v671_v56 = vadd.f32 %v670_v47, %v579_v54 }
 0x158   :  { %v415_v59 = vadd.f32 %v414_v52, %v322_v55 }
 0x159   :  { %v703_v58 = vmul.f32 %v1246_v57, %v671_v56 }
 0x15b   :  { %v730_v61 = vadd.f32 %v1257_v63, %v703_v58 }
 0x15c   :  { %v581_v62 = vpop.f32.mrf.mxu2 }
 0x15d   :  { %v755_v0 = vmax.f32 %v730_v61, 0.0  ;;  %v582_v1 = vadd.f32 %v581_v62, %v415_v59 }
 0x15f   :  { %v325_v2 = vpop.f32.mrf.mxu0  ;;  %780 = vst [vmem:[%s1479_s5 + $0xb0] sm:$0xff] %v755_v0  ;;  %v674_v4 = vadd.f32 %v673_v60, %v582_v1 }
 0x160   :  { %v418_v6 = vadd.f32 %v417_v3, %v325_v2 }
 0x161   :  { %v704_v5 = vmul.f32 %v1246_v57, %v674_v4 }
 0x163   :  { %v731_v7 = vadd.f32 %v1257_v63, %v704_v5 }
 0x164   :  { %v584_v8 = vpop.f32.mrf.mxu2 }
 0x165   :  { %v756_v10 = vmax.f32 %v731_v7, 0.0  ;;  %v585_v11 = vadd.f32 %v584_v8, %v418_v6 }
 0x167   :  { %781 = vst [vmem:[%s1479_s5 + $0xb8] sm:$0xff] %v756_v10  ;;  %v677_v12 = vadd.f32 %v676_v9, %v585_v11 }
 0x169   :  { %v705_v13 = vmul.f32 %v1246_v57, %v677_v12 }
 0x16b   :  { %v732_v14 = vadd.f32 %v1257_v63, %v705_v13 }
 0x16d   :  { %v757_v15 = vmax.f32 %v732_v14, 0.0 }
 0x16f   :  { %782 = vst [vmem:[%s1479_s5 + $0xc0] sm:$0xff] %v757_v15 }

</bundles_post_ra>
